<compile_context>
chip_gen: v7x
topology: tpu7x:2x2x1
jax: 0.10.0
libtpu: 0.0.40
codegen_flags: <defaults>
</compile_context>

<pallas_src>
import jax
import jax.numpy as jnp
from jax.experimental import pallas as pl
from jax.experimental.pallas import tpu as pltpu

_LANE = 128
_SUBLANE = 16  # bf16 sublane pack; also satisfies the (8, 128) block rule


def _round_up(x: int, m: int) -> int:
    return ((x + m - 1) // m) * m


def _device_kind() -> str:
    try:
        return jax.devices()[0].device_kind.lower()
    except Exception:
        return ""


def _vmem_limit_bytes() -> int:
    """Scoped-VMEM limit: physical per-core VMEM minus compiler headroom."""
    try:
        cap = int(pltpu.get_tpu_info().vmem_capacity_bytes)
    except Exception:
        cap = 64 * 1024 * 1024  # conservative fallback (v7x per-TC VMEM)
    return max(cap - 16 * 1024 * 1024, 32 * 1024 * 1024)


def _mlp_kernel(x_ref, w1_ref, b1_ref, w2_ref, b2_ref, o_ref, acc_ref):
    k = pl.program_id(1)

    @pl.when(k == 0)
    def _init():
        acc_ref[...] = jnp.zeros_like(acc_ref)

    # dot1: cast x to bf16 in-kernel (no extra wrapper-side HBM pass over x);
    # f32 accumulation on the MXU.
    h = jnp.dot(x_ref[...].astype(jnp.bfloat16), w1_ref[...],
                preferred_element_type=jnp.float32)

    # Bias + ReLU in the elementwise dtype selected by the wrapper via b1's
    # dtype (bf16 on v6e/v7x which have a bf16 VALU; f32 on v5e).
    b1 = b1_ref[...]
    h = jnp.maximum(h.astype(b1.dtype) + b1, 0)

    # dot2: bf16 operands, accumulate into the f32 scratch.  Supports the
    # hidden-dim-tiled path; degenerates to a single pass when n_hid == 1.
    acc_ref[...] += jnp.dot(h.astype(jnp.bfloat16), w2_ref[...],
                            preferred_element_type=jnp.float32)

    @pl.when(k == pl.num_programs(1) - 1)
    def _finish():
        o_ref[...] = (acc_ref[...] + b2_ref[...]).astype(o_ref.dtype)


def _choose_tiles(B, in_p, hid_p, out_p, hid_align, x_bytes, o_bytes,
                  vmem_limit, tm_max):
    """Derive (batch tile, hidden tile) from the per-core VMEM budget."""
    budget = int(vmem_limit * 0.7)  # leave slack for compiler scratch

    def w_bytes(th, nbuf):
        # bf16 W1-slice + W2-slice + (small) b1-slice, per buffer.
        return ((in_p * th + th * out_p) * 2 + th * 4) * nbuf

    # Hidden-dim tiling: keep weights resident (single-buffered) when they fit
    # in half the budget, otherwise stream double-buffered hidden slices.
    n_hid = 1
    while True:
        th = _round_up(-(-hid_p // n_hid), hid_align)
        nbuf = 1 if n_hid == 1 else 2
        if w_bytes(th, nbuf) <= budget // 2 or th == hid_align:
            break
        n_hid *= 2
    hid_pad = n_hid * th

    # Batch tile from the remaining budget.
    rem = max(budget - w_bytes(th, 1 if n_hid == 1 else 2), budget // 4)
    per_row = (2 * in_p * x_bytes      # x block (double-buffered, orig dtype)
               + 2 * out_p * o_bytes   # out block (double-buffered)
               + out_p * 4             # f32 accumulator scratch
               + th * 6)               # live f32 h + bf16 copy (estimate)
    tm_cap = max(min(rem // per_row, tm_max), _SUBLANE)

    n_batch = -(-B // tm_cap)
    if n_batch == 1 and B >= 2 * _SUBLANE:
        n_batch = 2  # let ("parallel", ...) shard across both v7x TCs
    tm = _round_up(-(-B // n_batch), _SUBLANE)
    b_pad = n_batch * tm
    return tm, b_pad, n_batch, th, hid_pad, n_hid


def linear_net_forward(x, w1, b1, w2, b2, *, out_dtype=None, tm_max=2048):
    """Pallas equivalent of LinearNet.forward: relu(x @ W1 + b1) @ W2 + b2.

    x:  [B, input_size]
    w1: [input_size, hidden_size]    (== torch linear1.weight.T)
    b1: [hidden_size] or [1, hidden_size]
    w2: [hidden_size, output_size]   (== torch linear2.weight.T)
    b2: [output_size] or [1, output_size]
    """
    B, in_size = x.shape
    hid_size = w1.shape[1]
    out_size = w2.shape[1]
    out_dtype = jnp.dtype(out_dtype or x.dtype)

    b1 = jnp.reshape(b1, (1, hid_size))
    b2 = jnp.reshape(b2, (1, out_size))

    kind = _device_kind()
    legacy = any(v in kind for v in ("v2", "v3", "v4", "v5"))
    hid_align = _LANE if legacy else 256            # 2x256x256 MXU on v6e/v7x
    ew_dtype = jnp.float32 if legacy else jnp.bfloat16  # bias+ReLU dtype

    in_p = _round_up(in_size, _LANE)
    out_p = _round_up(out_size, _LANE)
    hid_p = _round_up(hid_size, hid_align)

    vmem_limit = _vmem_limit_bytes()
    tm, b_pad, n_batch, th, hid_pad, n_hid = _choose_tiles(
        B, in_p, hid_p, out_p, hid_align,
        jnp.dtype(x.dtype).itemsize, out_dtype.itemsize, vmem_limit, tm_max)

    # Pad x only when needed; no dtype cast here (bf16 cast happens in-kernel)
    # so x is read from HBM exactly once.
    if b_pad != B or in_p != in_size:
        xp = jnp.pad(x, ((0, b_pad - B), (0, in_p - in_size)))
    else:
        xp = x

    # Weights: zero-pad feature dims (semantics-preserving for linear + ReLU)
    # and cast to the MXU dtype.
    w1p = w1
    if (in_p, hid_pad) != tuple(w1.shape):
        w1p = jnp.pad(w1, ((0, in_p - in_size), (0, hid_pad - hid_size)))
    w1p = w1p.astype(jnp.bfloat16)
    w2p = w2
    if (hid_pad, out_p) != tuple(w2.shape):
        w2p = jnp.pad(w2, ((0, hid_pad - hid_size), (0, out_p - out_size)))
    w2p = w2p.astype(jnp.bfloat16)
    b1p = jnp.pad(b1, ((0, 0), (0, hid_pad - hid_size))).astype(ew_dtype)
    b2p = jnp.pad(b2, ((0, 0), (0, out_p - out_size))).astype(jnp.float32)

    resident = n_hid == 1

    def _spec(shape, index_map, single_buffer):
        if single_buffer:
            # Constant-index operand: single-buffer to halve VMEM footprint.
            return pl.BlockSpec(shape, index_map, pipeline_mode=pl.Buffered(1))
        return pl.BlockSpec(shape, index_map)

    out_padded = pl.pallas_call(
        _mlp_kernel,
        out_shape=jax.ShapeDtypeStruct((b_pad, out_p), out_dtype),
        grid_spec=pltpu.PrefetchScalarGridSpec(
            num_scalar_prefetch=0,
            grid=(n_batch, n_hid),
            in_specs=[
                pl.BlockSpec((tm, in_p), lambda i, k: (i, 0)),      # x (batch)
                _spec((in_p, th), lambda i, k: (0, k), resident),   # W1
                _spec((1, th), lambda i, k: (0, k), resident),      # b1
                _spec((th, out_p), lambda i, k: (k, 0), resident),  # W2
                _spec((1, out_p), lambda i, k: (0, 0), True),       # b2
            ],
            out_specs=pl.BlockSpec((tm, out_p), lambda i, k: (i, 0)),
            scratch_shapes=[pltpu.VMEM((tm, out_p), jnp.float32)],
        ),
        compiler_params=pltpu.CompilerParams(
            dimension_semantics=("parallel", "arbitrary"),
            vmem_limit_bytes=vmem_limit,
        ),
    )(xp, w1p, b1p, w2p, b2p)

    if b_pad != B or out_p != out_size:
        return out_padded[:B, :out_size]
    return out_padded


def init_linear_params(key, in_features, out_features, dtype=jnp.float32):
    """nn.Linear-style init: U(-1/sqrt(fan_in), 1/sqrt(fan_in)).

    Returns (W_t, b) with W_t pre-transposed to [in_features, out_features].
    """
    k_w, k_b = jax.random.split(key)
    bound = 1.0 / float(in_features) ** 0.5
    w_t = jax.random.uniform(k_w, (in_features, out_features), dtype,
                             minval=-bound, maxval=bound)
    b = jax.random.uniform(k_b, (out_features,), dtype,
                           minval=-bound, maxval=bound)
    return w_t, b


# TODO(synk): LinearNet.save() (torch checkpoint I/O) is host-side and has no
# Pallas equivalent; only forward() is implemented here.

if __name__ == "__main__":
    # Small shapes consistent with LinearNet(input_size, hidden_size, output_size).
    batch, input_size, hidden_size, output_size = 8, 16, 32, 4

    key = jax.random.PRNGKey(0)
    k_x, k_l1, k_l2 = jax.random.split(key, 3)

    x = jax.random.normal(k_x, (batch, input_size), jnp.float32)
    w1, b1 = init_linear_params(k_l1, input_size, hidden_size)
    w2, b2 = init_linear_params(k_l2, hidden_size, output_size)

    out = jax.block_until_ready(linear_net_forward(x, w1, b1, w2, b2))

    # Pure-JAX f32 reference; kernel uses bf16 matmul operands so the
    # tolerance is correspondingly loose.
    ref = jnp.maximum(x @ w1 + b1, 0.0) @ w2 + b2
    assert out.shape == (batch, output_size)
    max_err = jnp.max(jnp.abs(out - ref))
    assert jnp.allclose(out, ref, atol=5e-2, rtol=5e-2), (
        f"max abs err {max_err}")

    print("KERNEL_OK")
</pallas_src>

<mosaic_0001>
module attributes {stable_mosaic.version = 11 : i64} {
  func.func @_mlp_kernel(%arg0: i32, %arg1: i32, %arg2: memref<16x128xf32, #tpu.memory_space<vmem>>, %arg3: memref<128x256xbf16, #tpu.memory_space<vmem>>, %arg4: memref<1x256xbf16, #tpu.memory_space<vmem>>, %arg5: memref<256x128xbf16, #tpu.memory_space<vmem>>, %arg6: memref<1x128xf32, #tpu.memory_space<vmem>>, %arg7: memref<16x128xf32, #tpu.memory_space<vmem>>, %arg8: memref<16x128xf32, #tpu.memory_space<vmem>>) attributes {dimension_semantics = [#tpu.dimension_semantics<parallel>, #tpu.dimension_semantics<arbitrary>], iteration_bounds = array<i64: 1, 1>, scalar_prefetch = 0 : i64, scratch_operands = 1 : i64, tpu.core_type = #tpu.core_type<tc>, window_params = [{transform_indices = @transform_0, window_bounds = array<i64: 16, 128>}, {pipeline_mode = #tpu.pipeline_mode<synchronous>, transform_indices = @transform_1, window_bounds = array<i64: 128, 256>}, {pipeline_mode = #tpu.pipeline_mode<synchronous>, transform_indices = @transform_2, window_bounds = array<i64: 1, 256>}, {pipeline_mode = #tpu.pipeline_mode<synchronous>, transform_indices = @transform_3, window_bounds = array<i64: 256, 128>}, {pipeline_mode = #tpu.pipeline_mode<synchronous>, transform_indices = @transform_4, window_bounds = array<i64: 1, 128>}, {transform_indices = @transform_5, window_bounds = array<i64: 16, 128>}]} {
    %c0_i32 = arith.constant 0 : i32
    %0 = arith.cmpi eq, %arg1, %c0_i32 : i32
    %1 = arith.extui %0 : i1 to i32
    %c0_i32_0 = arith.constant 0 : i32
    %2 = arith.cmpi ne, %1, %c0_i32_0 : i32
    scf.if %2 {
      %cst_16 = arith.constant 0.000000e+00 : f32
      %21 = vector.broadcast %cst_16 : f32 to vector<16x128xf32>
      %c0_17 = arith.constant 0 : index
      %c0_18 = arith.constant 0 : index
      %22 = vector.load %arg8[%c0_17, %c0_18] : memref<16x128xf32, #tpu.memory_space<vmem>>, vector<16x128xf32>
      tpu.vector_store %arg8[%c0_17, %c0_18], %21 {strides = array<i32>} : memref<16x128xf32, #tpu.memory_space<vmem>>, vector<16x128xf32>,
    } else {
    }
    %c0 = arith.constant 0 : index
    %c0_1 = arith.constant 0 : index
    %3 = vector.load %arg2[%c0, %c0_1] : memref<16x128xf32, #tpu.memory_space<vmem>>, vector<16x128xf32>
    %4 = arith.truncf %3 : vector<16x128xf32> to vector<16x128xbf16>
    %c0_2 = arith.constant 0 : index
    %c0_3 = arith.constant 0 : index
    %5 = vector.load %arg3[%c0_2, %c0_3] : memref<128x256xbf16, #tpu.memory_space<vmem>>, vector<128x256xbf16>
    %cst = arith.constant dense<0.000000e+00> : vector<16x256xf32>
    %6 = tpu.matmul %4, %5, %cst {dimension_numbers = #tpu.dot_dimension_numbers<[1], [0], [0], [1], [0, 0, 1, 1], [], []>} : vector<16x128xbf16>, vector<128x256xbf16>, vector<16x256xf32> -> vector<16x256xf32>
    %c0_4 = arith.constant 0 : index
    %c0_5 = arith.constant 0 : index
    %7 = vector.load %arg4[%c0_4, %c0_5] : memref<1x256xbf16, #tpu.memory_space<vmem>>, vector<1x256xbf16>
    %8 = arith.truncf %6 : vector<16x256xf32> to vector<16x256xbf16>
    %9 = vector.broadcast %7 : vector<1x256xbf16> to vector<16x256xbf16>
    %10 = arith.addf %8, %9 : vector<16x256xbf16>
    %cst_6 = arith.constant 0.000000e+00 : bf16
    %11 = vector.broadcast %cst_6 : bf16 to vector<16x256xbf16>
    %12 = arith.maximumf %10, %11 : vector<16x256xbf16>
    %c0_7 = arith.constant 0 : index
    %c0_8 = arith.constant 0 : index
    %13 = vector.load %arg8[%c0_7, %c0_8] : memref<16x128xf32, #tpu.memory_space<vmem>>, vector<16x128xf32>
    %c0_9 = arith.constant 0 : index
    %c0_10 = arith.constant 0 : index
    %14 = vector.load %arg5[%c0_9, %c0_10] : memref<256x128xbf16, #tpu.memory_space<vmem>>, vector<256x128xbf16>
    %cst_11 = arith.constant dense<0.000000e+00> : vector<16x128xf32>
    %15 = tpu.matmul %12, %14, %cst_11 {dimension_numbers = #tpu.dot_dimension_numbers<[1], [0], [0], [1], [0, 0, 1, 1], [], []>} : vector<16x256xbf16>, vector<256x128xbf16>, vector<16x128xf32> -> vector<16x128xf32>
    %16 = arith.addf %13, %15 : vector<16x128xf32>
    %c0_12 = arith.constant 0 : index
    %c0_13 = arith.constant 0 : index
    %17 = vector.load %arg8[%c0_12, %c0_13] : memref<16x128xf32, #tpu.memory_space<vmem>>, vector<16x128xf32>
    tpu.vector_store %arg8[%c0_12, %c0_13], %16 {strides = array<i32>} : memref<16x128xf32, #tpu.memory_space<vmem>>, vector<16x128xf32>,
    %c0_i32_14 = arith.constant 0 : i32
    %18 = arith.cmpi eq, %arg1, %c0_i32_14 : i32
    %19 = arith.extui %18 : i1 to i32
    %c0_i32_15 = arith.constant 0 : i32
    %20 = arith.cmpi ne, %19, %c0_i32_15 : i32
    scf.if %20 {
      %c0_16 = arith.constant 0 : index
      %c0_17 = arith.constant 0 : index
      %21 = vector.load %arg8[%c0_16, %c0_17] : memref<16x128xf32, #tpu.memory_space<vmem>>, vector<16x128xf32>
      %c0_18 = arith.constant 0 : index
      %c0_19 = arith.constant 0 : index
      %22 = vector.load %arg6[%c0_18, %c0_19] : memref<1x128xf32, #tpu.memory_space<vmem>>, vector<1x128xf32>
      %23 = vector.broadcast %22 : vector<1x128xf32> to vector<16x128xf32>
      %24 = arith.addf %21, %23 : vector<16x128xf32>
      %c0_20 = arith.constant 0 : index
      %c0_21 = arith.constant 0 : index
      %25 = vector.load %arg7[%c0_20, %c0_21] : memref<16x128xf32, #tpu.memory_space<vmem>>, vector<16x128xf32>
      tpu.vector_store %arg7[%c0_20, %c0_21], %24 {strides = array<i32>} : memref<16x128xf32, #tpu.memory_space<vmem>>, vector<16x128xf32>,
    } else {
    }
    return
  }
  func.func @transform_0(%arg0: i32, %arg1: i32) -> (i32, i32) {
    %c0_i32 = arith.constant 0 : i32
    %c0_i32_0 = arith.constant 0 : i32
    return %arg0, %c0_i32 : i32, i32
  }
  func.func @transform_1(%arg0: i32, %arg1: i32) -> (i32, i32) {
    %c0_i32 = arith.constant 0 : i32
    %c0_i32_0 = arith.constant 0 : i32
    return %c0_i32, %arg1 : i32, i32
  }
  func.func @transform_2(%arg0: i32, %arg1: i32) -> (i32, i32) {
    %c0_i32 = arith.constant 0 : i32
    %c0_i32_0 = arith.constant 0 : i32
    return %c0_i32, %arg1 : i32, i32
  }
  func.func @transform_3(%arg0: i32, %arg1: i32) -> (i32, i32) {
    %c0_i32 = arith.constant 0 : i32
    %c0_i32_0 = arith.constant 0 : i32
    return %arg1, %c0_i32 : i32, i32
  }
  func.func @transform_4(%arg0: i32, %arg1: i32) -> (i32, i32) {
    %c0_i32 = arith.constant 0 : i32
    %c0_i32_0 = arith.constant 0 : i32
    %c0_i32_1 = arith.constant 0 : i32
    return %c0_i32, %c0_i32_0 : i32, i32
  }
  func.func @transform_5(%arg0: i32, %arg1: i32) -> (i32, i32) {
    %c0_i32 = arith.constant 0 : i32
    %c0_i32_0 = arith.constant 0 : i32
    return %arg0, %c0_i32 : i32, i32
  }
}

</mosaic_0001>

<bundles_post_ra>
// kernel: tpu_custom_call.1
= control target key start
LH: loop header
LB: loop body
LE: loop exit
PB: predicated region body
PF: predicated region fallthrough
CT: control target
= control target key end

     0   :  { %10 = vsyncpa [#allocation4], 0  ;;  %s777_s0 = inlined_call_operand.hbm [shape: f32[16,128], index: 0, kind: input, shape index: {}]   ;;  %s778_s1 = inlined_call_operand.hbm [shape: bf16[128,256], index: 1, kind: input, shape index: {}]   ;;  %s779_s2 = inlined_call_operand.vmem [shape: bf16[1,256], index: 2, kind: input, shape index: {}]   ;;  %s780_s3 = inlined_call_operand.hbm [shape: bf16[256,128], index: 3, kind: input, shape index: {}]   ;;  %s781_s4 = inlined_call_operand.vmem [shape: f32[1,128], index: 4, kind: input, shape index: {}]   ;;  %s782_s5 = inlined_call_operand.hbm [shape: f32[16,128], index: 5, kind: output, shape index: {}]  }
   0x1   :  { %11 = vsyncpa [#allocation7], 0 }
   0x2   :  { %12 = vsyncpa [#allocation5], 0  ;;  %s664_s18 = smov [#allocation6]   ;;  %s665_s20 = smov [#allocation3]  }
   0x3   :  { %s30_s19 = sshll.u32 %s664_s18, 4  ;;  %s18_s21 = sshll.u32 %s665_s20, 4  ;;  %s31_s19 = int_to_ptr.vmem [resolvable:$true] %s30_s19  ;;  %s704_s21 = int_to_ptr.vmem [resolvable:$true] %s18_s21 }
   0x4   :  { %s570_s24 = scalar_lea.hbm %s778_s1, 2048 }
   0x5   :  { %p571_p0 = scmp.ne.s32.totalorder %s778_s1, %s570_s24  ;;  %p574_p1 = scmp.lt.u32.totalorder %s570_s24, %s778_s1 }
   0x7   :  { %p576_p2 = pnand %p574_p1, %p571_p0 }
   0x9   :  { %579 = shalt.err (!%p576_p2)
}
   0xa   :  { %s580_s29 = scalar_lea.vmem %s31_s19, 2048  ;;  %p585_p4 = scmp.lt.s32.totalorder %s31_s19, %s31_s19 }
   0xb   :  { %p581_p3 = scmp.ne.s32.totalorder %s31_s19, %s580_s29  ;;  %p586_p5 = scmp.lt.s32.totalorder %s580_s29, %s580_s29 }
   0xd   :  { %p587_p6 = por %p586_p5, %p585_p4 }
   0xf   :  { %p588_p7 = pnand %p587_p6, %p581_p3 }
  0x11   :  { %591 = shalt.err (!%p588_p7)
}
  0x12   :  { %s666_s30 = smov 128   ;;  %s667_s6 = smov 8  }
  0x13   :  { %36 = dma.hbm_to_vmem [thread:$0]  %s778_s1, 2048, %s31_s19, [#allocation7], %s666_s30, %s666_s30, %s667_s6  }
  0x14   :  { %s592_s11 = scalar_lea.hbm %s777_s0, 256 }
  0x15   :  { %p593_p8 = scmp.ne.s32.totalorder %s777_s0, %s592_s11  ;;  %p596_p9 = scmp.lt.u32.totalorder %s592_s11, %s777_s0 }
  0x17   :  { %p598_p10 = pnand %p596_p9, %p593_p8 }
  0x19   :  { %601 = shalt.err (!%p598_p10)
}
  0x1a   :  { %s602_s16 = scalar_lea.vmem %s704_s21, 256  ;;  %p607_p12 = scmp.lt.s32.totalorder %s704_s21, %s704_s21 }
  0x1b   :  { %p603_p11 = scmp.ne.s32.totalorder %s704_s21, %s602_s16  ;;  %p608_p13 = scmp.lt.s32.totalorder %s602_s16, %s602_s16 }
  0x1d   :  { %p609_p0 = por %p608_p13, %p607_p12 }
  0x1f   :  { %p610_p1 = pnand %p609_p0, %p603_p11 }
  0x21   :  { %613 = shalt.err (!%p610_p1)
}
  0x22   :  { %24 = dma.hbm_to_vmem [thread:$0]  %s777_s0, 256, %s704_s21, [#allocation4], %s666_s30, %s666_s30, %s667_s6  }
  0x23   :  { %s668_s18 = smov [#allocation8]   ;;  %s614_s23 = scalar_lea.hbm %s780_s3, 2048 }
  0x24   :  { %s44_s19 = sshll.u32 %s668_s18, 4  ;;  %p615_p2 = scmp.ne.s32.totalorder %s780_s3, %s614_s23  ;;  %s45_s19 = int_to_ptr.vmem [resolvable:$true] %s44_s19 }
  0x25   :  { %p618_p3 = scmp.lt.u32.totalorder %s614_s23, %s780_s3 }
  0x27   :  { %p620_p4 = pnand %p618_p3, %p615_p2 }
  0x29   :  { %623 = shalt.err (!%p620_p4)
}
  0x2a   :  { %s624_s28 = scalar_lea.vmem %s45_s19, 2048  ;;  %p629_p6 = scmp.lt.s32.totalorder %s45_s19, %s45_s19 }
  0x2b   :  { %p625_p5 = scmp.ne.s32.totalorder %s45_s19, %s624_s28  ;;  %p630_p7 = scmp.lt.s32.totalorder %s624_s28, %s624_s28 }
  0x2d   :  { %p631_p8 = por %p630_p7, %p629_p6 }
  0x2f   :  { %p632_p9 = pnand %p631_p8, %p625_p5 }
  0x31   :  { %635 = shalt.err (!%p632_p9)
}
  0x32   :  { %s669_s0 = smov 64   ;;  %s670_s21 = smov 4  }
  0x33   :  { %50 = dma.hbm_to_vmem [thread:$0]  %s780_s3, 2048, %s45_s19, [#allocation7], %s669_s0, %s669_s0, %s670_s21  }
  0x34   :  { %658 = dma.done.wait [#allocation4], 256  }
  0x35   :  { %659 = vsyncadd [#allocation4], 4294967040 }
  0x36   :  { %660 = dma.done.wait [#allocation7], 4096  }
  0x37   :  { %661 = vsyncadd [#allocation7], 4294963200  ;;  %v671_v0 = vmov 0   ;;  %v530_v1 = vld [vmem:[#allocation6 + $0x4] ss:$8 sps:$4 sm:$0xff]   ;;  %v558_v16 = vld [vmem:[#allocation8 + $0x50] sm:$0xff]   ;;  %v226_v38 = vlaneseq }
  0x38   :  { %200 = vmatprep.mubr.bf16.mxu0 %v671_v0  ;;  %v532_v2 = vld [vmem:[#allocation6] ss:$8 sps:$4 sm:$0xff]   ;;  %168 = vmatprep.subr.bf16.mxu0 %v530_v1  ;;  %v533_v3 = vld [vmem:[#allocation6 + $0x14] ss:$8 sps:$4 sm:$0xff]   ;;  %v535_v4 = vld [vmem:[#allocation6 + $0x10] ss:$8 sps:$4 sm:$0xff]  }
  0x39   :  { %169 = vmatpush1.bf16.msra.mxu0 %v532_v2  ;;  %v536_v5 = vld [vmem:[#allocation6 + $0x24] ss:$8 sps:$4 sm:$0xff]   ;;  %v538_v6 = vld [vmem:[#allocation6 + $0x20] ss:$8 sps:$4 sm:$0xff]   ;;  %v539_v7 = vld [vmem:[#allocation6 + $0x34] ss:$8 sps:$4 sm:$0xff]  }
  0x3a   :  { %170 = vmatprep.subr.bf16.mxu0 %v533_v3  ;;  %v541_v8 = vld [vmem:[#allocation6 + $0x30] ss:$8 sps:$4 sm:$0xff]   ;;  %v542_v9 = vld [vmem:[#allocation6 + $0x44] ss:$8 sps:$4 sm:$0xff]   ;;  %v544_v11 = vld [vmem:[#allocation6 + $0x40] ss:$8 sps:$4 sm:$0xff]  }
  0x3b   :  { %v554_v10 = vld [vmem:[#allocation8 + $0x40] sm:$0xff]   ;;  %v545_v13 = vld [vmem:[#allocation6 + $0x54] ss:$8 sps:$4 sm:$0xff]   ;;  %v556_v14 = vld [vmem:[#allocation8 + $0x48] sm:$0xff]   ;;  %v672_v36 = vmov 1966171168  }
  0x3c   :  { %v555_v12 = vld [vmem:[#allocation8] sm:$0xff]   ;;  %498 = vmatprep.subr.bf16.mxu1 %v554_v10  ;;  %v557_v15 = vld [vmem:[#allocation8 + $0x8] sm:$0xff]   ;;  %v547_v17 = vld [vmem:[#allocation6 + $0x50] ss:$8 sps:$4 sm:$0xff]   ;;  %v224_v37 = vunpack.c.l.s4 %v672_v36  ;;  %v227_v40 = vshrl.u32 %v226_v38, 7  ;;  %s673_s10 = smov [#allocation9]  }
  0x3d   :  { %171 = vmatpush1.bf16.msra.mxu0 %v535_v4  ;;  %499 = vmatpush3.bf16.msra.mxu1 %v555_v12  ;;  %v548_v18 = vld [vmem:[#allocation6 + $0x64] ss:$8 sps:$4 sm:$0xff]   ;;  %v559_v19 = vld [vmem:[#allocation8 + $0x10] sm:$0xff]   ;;  %v560_v20 = vld [vmem:[#allocation8 + $0x58] sm:$0xff]   ;;  %s451_s11 = sshll.u32 %s673_s10, 4  ;;  %s452_s11 = int_to_ptr.vmem [resolvable:$true] %s451_s11 }
  0x3e   :  { %172 = vmatprep.subr.bf16.mxu0 %v536_v5  ;;  %500 = vmatprep.subr.bf16.mxu1 %v556_v14  ;;  %v550_v21 = vld [vmem:[#allocation6 + $0x60] ss:$8 sps:$4 sm:$0xff]   ;;  %v561_v22 = vld [vmem:[#allocation8 + $0x18] sm:$0xff]   ;;  %v69_v26 = vld [vmem:[#allocation3] sm:$0xff]  ;;  %v225_v39 = vunpack.c.0.s8 %v224_v37  ;;  %v242_v47 = vsub.s32 0, %v227_v40  ;;  %s636_s12 = scalar_lea.vmem %s452_s11, 256  ;;  %p641_p11 = scmp.lt.s32.totalorder %s452_s11, %s452_s11 }
  0x3f   :  { %v551_v23 = vld [vmem:[#allocation6 + $0x74] ss:$8 sps:$4 sm:$0xff]   ;;  %v562_v24 = vld [vmem:[#allocation8 + $0x60] sm:$0xff]   ;;  %v553_v25 = vld [vmem:[#allocation6 + $0x70] ss:$8 sps:$4 sm:$0xff]   ;;  %p637_p10 = scmp.ne.s32.totalorder %s452_s11, %s636_s12  ;;  %p642_p12 = scmp.lt.s32.totalorder %s636_s12, %s636_s12 }
  0x40   :  { %v70_v27 = vld [vmem:[#allocation3 + $0x8] sm:$0xff]  ;;  %v563_v28 = vld [vmem:[#allocation8 + $0x20] sm:$0xff]   ;;  %v564_v29 = vld [vmem:[#allocation8 + $0x68] sm:$0xff]   ;;  %v228_v42 = vsub.s32 %v225_v39, %v227_v40 }
  0x41   :  { %173 = vmatpush1.bf16.msra.mxu0 %v538_v6  ;;  %501 = vmatpush3.bf16.msra.mxu1 %v557_v15  ;;  %v71_v30 = vpack.c.bf16 %v70_v27, %v69_v26  ;;  %v565_v31 = vld [vmem:[#allocation8 + $0x28] sm:$0xff]   ;;  %v566_v32 = vld [vmem:[#allocation8 + $0x70] sm:$0xff]   ;;  %v568_v34 = vld [vmem:[#allocation8 + $0x78] sm:$0xff]   ;;  %p643_p13 = por %p642_p12, %p641_p11 }
  0x42   :  { %174 = vmatprep.subr.bf16.mxu0 %v539_v7  ;;  %502 = vmatprep.subr.bf16.mxu1 %v558_v16  ;;  %v567_v33 = vld [vmem:[#allocation8 + $0x30] sm:$0xff]   ;;  %v569_v35 = vld [vmem:[#allocation8 + $0x38] sm:$0xff]  }
  0x43   :  { %v480_v41 = vld.sshfl [vmem:[%s779_s2] sm:$0x11 pattern:$0x75316420]  ;;  %p644_p0 = pnand %p643_p13, %p637_p10 }
  0x44   :  { %v222_v43 = vcombine.high %v480_v41, %v480_v41  ;;  %v229_v44 = vrot.slane %v480_v41, %v228_v42  ;;  %v497_v63 = vld [vmem:[%s781_s4] ss:$0 sm:$0xff] }
  0x45   :  { %175 = vmatpush1.bf16.msra.mxu0 %v541_v8  ;;  %503 = vmatpush3.bf16.msra.mxu1 %v559_v19 }
  0x46   :  { %176 = vmatprep.subr.bf16.mxu0 %v542_v9  ;;  %504 = vmatprep.subr.bf16.mxu1 %v560_v20  ;;  %v236_v45 = vrot.slane %v222_v43, %v228_v42  ;;  %v238_v46 = vpack.i.b16 %v229_v44, %v229_v44 }
  0x48   :  { %v245_v48 = vpack.i.b16 %v236_v45, %v236_v45  ;;  %v243_v51 = vrot.slane %v238_v46, %v242_v47 }
  0x49   :  { %177 = vmatpush1.bf16.msra.mxu0 %v544_v11  ;;  %505 = vmatpush3.bf16.msra.mxu1 %v561_v22 }
  0x4a   :  { %178 = vmatprep.subr.bf16.mxu0 %v545_v13  ;;  %506 = vmatprep.subr.bf16.mxu1 %v562_v24  ;;  %v250_v53 = vrot.slane %v245_v48, %v242_v47 }
  0x4d   :  { %179 = vmatpush1.bf16.msra.mxu0 %v547_v17  ;;  %507 = vmatpush3.bf16.msra.mxu1 %v563_v28 }
  0x4e   :  { %180 = vmatprep.subr.bf16.mxu0 %v548_v18  ;;  %508 = vmatprep.subr.bf16.mxu1 %v564_v29 }
  0x51   :  { %181 = vmatpush1.bf16.msra.mxu0 %v550_v21  ;;  %509 = vmatpush3.bf16.msra.mxu1 %v565_v31 }
  0x52   :  { %182 = vmatprep.subr.bf16.mxu0 %v551_v23  ;;  %510 = vmatprep.subr.bf16.mxu1 %v566_v32 }
  0x55   :  { %183 = vmatpush1.bf16.msra.mxu0 %v553_v25  ;;  %511 = vmatpush3.bf16.msra.mxu1 %v567_v33 }
  0x56   :  { %512 = vmatprep.subr.bf16.mxu1 %v568_v34 }
  0x58   :  { %201 = vmatmul.mubr.bf16.vlgmr.msra.gmra.mrb[0].mxu0 %v71_v30 }
  0x59   :  { %513 = vmatpush3.bf16.msra.mxu1 %v569_v35 }
 0x12b   :  { %v202_v49 = vpop.f32.mrb[0].mxu0 }
 0x12c   :  { %v204_v50 = vpop.f32.mrb[1].mxu0 }
 0x12d   :  { %v206_v52 = vpop.f32.mrb[2].mxu0 }
 0x12e   :  { %v212_v54 = vpack.c.bf16 %v206_v52, %v202_v49  ;;  %v208_v55 = vpop.f32.mrb[3].mxu0 }
 0x12f   :  { %v213_v56 = vpack.c.bf16 %v208_v55, %v204_v50 }
 0x130   :  { %v251_v57 = vadd.bf16 %v243_v51, %v212_v54 }
 0x131   :  { %v252_v58 = vadd.bf16 %v250_v53, %v213_v56 }
 0x132   :  { %v253_v60 = vmax.bf16 %v671_v0, %v251_v57 }
 0x133   :  { %v254_v59 = vmax.bf16 %v671_v0, %v252_v58 }
 0x135   :  { %417 = vmatprep.mubr.bf16.mxu1 %v254_v59 }
 0x136   :  { %418 = vmatmul.mubr.bf16.vlgmr.msra.gmra.mrb[0].mxu1 %v253_v60 }
 0x209   :  { %v514_v61 = vpop.f32.mrb[0].mxu1 }
 0x20a   :  { %v515_v62 = vpop.f32.mrb[1].mxu1 }
 0x20b   :  { %v516_v1 = vadd.f32 %v515_v62, %v514_v61  ;;  %v517_v2 = vpop.f32.mrb[2].mxu1 }
 0x20c   :  { %v518_v3 = vpop.f32.mrb[3].mxu1 }
 0x20d   :  { %v442_v4 = vadd.f32 %v516_v1, %v497_v63  ;;  %v519_v5 = vadd.f32 %v518_v3, %v517_v2 }
 0x20f   :  { %444 = vst [vmem:[#allocation9] sm:$0xff] %v442_v4  ;;  %v443_v6 = vadd.f32 %v519_v5, %v497_v63 }
 0x211   :  { %445 = vst [vmem:[#allocation9 + $0x8] sm:$0xff] %v443_v6 }
 0x212   :  { %647 = shalt.err (!%p644_p0)
}
 0x213   :  { %s648_s14 = scalar_lea.hbm %s782_s5, 256 }
 0x214   :  { %p649_p1 = scmp.ne.s32.totalorder %s782_s5, %s648_s14  ;;  %p652_p2 = scmp.lt.u32.totalorder %s648_s14, %s782_s5 }
 0x216   :  { %p654_p3 = pnand %p652_p2, %p649_p1 }
 0x218   :  { %657 = shalt.err (!%p654_p3)
}
 0x219   :  { %457 = dma.vmem_to_hbm [thread:$0]  %s452_s11, 256, %s782_s5, [#allocation5], %s666_s30, %s666_s30, %s667_s6  }
 0x21a   :  { %662 = dma.done.wait [#allocation5], 256  }
 0x21b   :  { %663 = vsyncadd [#allocation5], 4294967040 }
 0x21c   :  { %461 = vsyncpa [#allocation4], 1 }
 0x21d   :  { %462 = vsyncpa [#allocation7], 1 }
 0x21e   :  { %463 = vsyncpa [#allocation5], 1 }

</bundles_post_ra>
